<compile_context>
chip_gen: v6e
topology: v6e:2x2x1
jax: 0.10.0
libtpu: 0.0.40
codegen_flags: <defaults>
</compile_context>

<pallas_src>
import jax
import jax.numpy as jnp
from jax.experimental import pallas as pl
from jax.experimental.pallas import tpu as pltpu


def matmul_sum_kernel(m1_ref, m2_ref, a_ref, o_ref):
    # m1_ref, m2_ref: (1, n) f32 in VMEM
    # a_ref:          (1, 1) f32 in SMEM (scalar)
    # o_ref:          (1, 1) f32 in VMEM
    prod = m1_ref[...] * m2_ref[...]                       # VPU elementwise
    dot = jnp.sum(prod, axis=-1, keepdims=True)            # XLU lane reduce -> (1,1)
    o_ref[...] = dot + a_ref[0, 0]                         # scalar-from-SMEM broadcast add


@jax.jit
def matmul_sum(m1, m2, a):
    """Dot product of two 1-D vectors plus a scalar, computed in Pallas."""
    assert m1.ndim == 1 and m2.ndim == 1 and m1.shape == m2.shape
    n = m1.shape[0]

    # Direct operands: no HBM staging fusion, no lane padding.
    m1_2d = m1.astype(jnp.float32).reshape(1, n)
    m2_2d = m2.astype(jnp.float32).reshape(1, n)
    a_2d = jnp.asarray(a, dtype=jnp.float32).reshape(1, 1)

    out = pl.pallas_call(
        matmul_sum_kernel,
        out_shape=jax.ShapeDtypeStruct((1, 1), jnp.float32),
        in_specs=[
            pl.BlockSpec(memory_space=pltpu.VMEM),   # m1 (1, n)
            pl.BlockSpec(memory_space=pltpu.VMEM),   # m2 (1, n)
            pl.BlockSpec(memory_space=pltpu.SMEM),   # a  (1, 1) scalar
        ],
        out_specs=pl.BlockSpec(memory_space=pltpu.VMEM),
        cost_estimate=pl.CostEstimate(
            flops=2 * n,                              # n mul + n add
            transcendentals=0,
            bytes_accessed=(2 * n + 2) * 4,           # two vectors + a + result
        ),
    )(m1_2d, m2_2d, a_2d)

    return jnp.reshape(out, ())  # 0-d scalar, matching torch.matmul(1D,1D) + a


if __name__ == "__main__":
    key = jax.random.PRNGKey(0)
    k1, k2, k3 = jax.random.split(key, 3)
    # Shapes follow the test: m1, m2 are [6] vectors, a is a scalar.
    m1 = jax.random.normal(k1, (6,), dtype=jnp.float32)
    m2 = jax.random.normal(k2, (6,), dtype=jnp.float32)
    a = jax.random.normal(k3, (), dtype=jnp.float32)

    y = matmul_sum(m1, m2, a)
    jax.block_until_ready(y)

    y_ref = jnp.dot(m1, m2) + a
    assert jnp.allclose(y, y_ref, atol=1e-5, rtol=1e-5), (y, y_ref)
    print("KERNEL_OK")
</pallas_src>

<mosaic_0001>
module attributes {stable_mosaic.version = 11 : i64} {
  func.func @matmul_sum_kernel(%arg0: memref<1x6xf32, #tpu.memory_space<vmem>>, %arg1: memref<1x6xf32, #tpu.memory_space<vmem>>, %arg2: memref<1x1xf32, #tpu.memory_space<smem>>, %arg3: memref<1x1xf32, #tpu.memory_space<vmem>>) attributes {dimension_semantics = [], scalar_prefetch = 0 : i64, scratch_operands = 0 : i64, tpu.core_type = #tpu.core_type<tc>} {
    %c0 = arith.constant 0 : index
    %c0_0 = arith.constant 0 : index
    %0 = vector.load %arg0[%c0, %c0_0] : memref<1x6xf32, #tpu.memory_space<vmem>>, vector<1x6xf32>
    %c0_1 = arith.constant 0 : index
    %c0_2 = arith.constant 0 : index
    %1 = vector.load %arg1[%c0_1, %c0_2] : memref<1x6xf32, #tpu.memory_space<vmem>>, vector<1x6xf32>
    %2 = arith.mulf %0, %1 : vector<1x6xf32>
    %cst = arith.constant dense<0.000000e+00> : vector<1xf32>
    %3 = vector.multi_reduction <add>, %2, %cst [1] : vector<1x6xf32> to vector<1xf32>
    %4 = vector.shape_cast %3 : vector<1xf32> to vector<1x1xf32>
    %c0_3 = arith.constant 0 : index
    %c0_4 = arith.constant 0 : index
    %5 = memref.load %arg2[%c0_3, %c0_4] : memref<1x1xf32, #tpu.memory_space<smem>>
    %6 = vector.broadcast %5 : f32 to vector<1x1xf32>
    %7 = arith.addf %4, %6 : vector<1x1xf32>
    %c0_5 = arith.constant 0 : index
    %c0_6 = arith.constant 0 : index
    %8 = vector.load %arg3[%c0_5, %c0_6] : memref<1x1xf32, #tpu.memory_space<vmem>>, vector<1x1xf32>
    tpu.vector_store %arg3[%c0_5, %c0_6], %7 {strides = array<i32>} : memref<1x1xf32, #tpu.memory_space<vmem>>, vector<1x1xf32>,
    return
  }
}

</mosaic_0001>

<bundles_post_ra>
// kernel: matmul_sum.1
= control target key start
LH: loop header
LB: loop body
LE: loop exit
PB: predicated region body
PF: predicated region fallthrough
CT: control target
= control target key end

     0   :  { %vm19_vm0 = vcmask 40960   ;;  %s98_s0 = inlined_call_operand.vmem [shape: f32[1,6], index: 0, kind: input, shape index: {}]   ;;  %s99_s1 = inlined_call_operand.vmem [shape: f32[1,6], index: 1, kind: input, shape index: {}]   ;;  %s100_s2 = inlined_call_operand.<no memory space> [shape: f32[1,1], index: 2, kind: input, shape index: {}]   ;;  %s101_s3 = inlined_call_operand.hbm [shape: f32[1,1], index: 3, kind: output, shape index: {}]  }
   0x1   :  { %v16_v0 = vld [vmem:[%s98_s0] sm:$0x1] }
   0x2   :  { %v17_v1 = vld [vmem:[%s99_s1] sm:$0x1] }
   0x3   :  { %v18_v2 = vmul.f32 %v17_v1, %v16_v0 }
   0x4   :  { %9 = vsyncpa [#allocation4], 0  ;;  %v24_v4 = vstv %s100_s2  ;;  %s65_s18 = smov [#allocation3]   ;;  %vm26_vm1 = vcmask 0  }
   0x5   :  { %v20_v3 = vsel %vm19_vm0, %v18_v2, 0.0  ;;  %s34_s19 = sshll.u32 %s65_s18, 4  ;;  %s35_s19 = int_to_ptr.vmem [resolvable:$true] %s34_s19 }
   0x6   :  { %21 = vadd.xlane.f32.xlu0 %v20_v3  ;;  %s43_s0 = scalar_lea.vmem %s35_s19, 16  ;;  %s47_s20 = scalar_lea.vmem %s35_s19, 32 }
   0x7   :  { %p44_p0 = scmp.ne.s32.totalorder %s35_s19, %s43_s0  ;;  %p48_p1 = scmp.lt.s32.totalorder %s35_s19, %s35_s19 }
   0x8   :  { %p49_p2 = scmp.lt.s32.totalorder %s47_s20, %s43_s0 }
   0xa   :  { %p50_p3 = por %p49_p2, %p48_p1 }
   0xc   :  { %p51_p4 = pnand %p50_p3, %p44_p0 }
  0x8f   :  { %v22_v5 = vpop.xlane.xlu0 %21 }
  0x90   :  { %v25_v6 = vadd.f32 %v24_v4, %v22_v5 }
  0x92   :  { %27 = vst.msk [vmem:[#allocation3] sm:$0x1] %vm26_vm1, %v25_v6 }
  0x93   :  { %54 = shalt.err (!%p51_p4)
}
  0x94   :  { %37 = dma.vmem_to_hbm [thread:$0]  %s35_s19, 16, %s101_s3, [#allocation4]  }
  0x95   :  { %63 = dma.done.wait [#allocation4], 16  }
  0x96   :  { %64 = vsyncadd [#allocation4], 4294967280 }
  0x97   :  { %41 = vsyncpa [#allocation4], 1 }

</bundles_post_ra>
